<compile_context>
chip_gen: v7x
topology: tpu7x:2x2x1
jax: 0.10.0
libtpu: 0.0.40
codegen_flags: <defaults>
</compile_context>

<pallas_src>
import functools
import math

import jax
import jax.numpy as jnp
from jax.experimental import pallas as pl
from jax.experimental.pallas import tpu as pltpu


LANE = 128     # hidden feature dims padded to multiples of the lane width
SUBLANE = 8    # f32 sublane granularity for the batch tile


def _round_up(n: int, m: int) -> int:
    return ((n + m - 1) // m) * m


def _mlp_kernel(x_ref, *refs, n_layers: int):
    """Fused MLP.  refs = (w1, b1, w2, b2, ..., wn, bn, o_ref).

    x_ref : (tb, D0)          f32 activation tile
    wi    : (D(i-1)p, Dip)    weight (compute dtype), VMEM-resident across grid
    bi    : (1, Dip)          f32 bias, VMEM-resident
    o_ref : (tb, Dn)          f32 output tile (true, unpadded width)
    """
    o_ref = refs[2 * n_layers]
    h = x_ref[...]
    for i in range(n_layers):
        w = refs[2 * i][...]
        b = refs[2 * i + 1][...]
        h = jnp.dot(h.astype(w.dtype), w, preferred_element_type=jnp.float32) + b
        if i < n_layers - 1:
            h = jnp.maximum(h, 0.0)
    o_ref[...] = h.astype(o_ref.dtype)


def pack_params(params, compute_dtype=jnp.float32):
    """One-time packing: pad hidden widths to LANE multiples, cast to the
    compute dtype.  Runs OUTSIDE the jitted forward so the per-call path has
    no pad/convert ops.  Input and output feature dims stay unpadded (their
    BlockSpecs cover the full array, which the (8,128) rule allows).

    params: list of (w, b); w is (in, out) (transpose of nn.Linear.weight),
            b is (out,).  Zero padding is mathematically exact.
    """
    packed = []
    n = len(params)
    for i, (w, b) in enumerate(params):
        d_in_i, d_out_i = w.shape
        din_p = d_in_i if i == 0 else _round_up(d_in_i, LANE)
        dout_p = d_out_i if i == n - 1 else _round_up(d_out_i, LANE)
        w_p = (jnp.zeros((din_p, dout_p), compute_dtype)
               .at[:d_in_i, :d_out_i].set(w.astype(compute_dtype)))
        b_p = (jnp.zeros((1, dout_p), jnp.float32)
               .at[0, :d_out_i].set(b.astype(jnp.float32)))
        packed.append((w_p, b_p))
    return packed


def _vmem_limit_bytes(packed, tb, d_in, widths, d_out):
    """Size the scoped-VMEM limit from the actual resident footprint."""
    dbl = 2  # Mosaic double-buffers each pallas_call operand by default.
    w_bytes = sum(int(w.size) * w.dtype.itemsize + int(b.size) * b.dtype.itemsize
                  for w, b in packed) * dbl
    io_bytes = (tb * d_in * 4 + tb * d_out * 4) * dbl
    act_bytes = 2 * tb * max(widths) * 4          # in-kernel activation temporaries
    total = w_bytes + io_bytes + act_bytes + (1 << 20)   # + slack for Mosaic scratch
    return int(min(max(total, 4 << 20), 100 << 20))


def mlp_forward(packed, x, *, tile_b: int = 512):
    """Equivalent of NN.forward as ONE Pallas kernel over pre-packed params.

    packed: output of pack_params().
    x     : (B, in) float32.
    """
    B, d_in = x.shape
    n_layers = len(packed)
    assert packed[0][0].shape[0] == d_in
    d_out = packed[-1][0].shape[1]
    widths = [d_in] + [w.shape[1] for (w, _) in packed]

    # ---- batch tiling: never force an artificial split ------------------
    # Tiny workloads run as a single grid step (per-step overhead ~0.35us
    # dwarfs the MXU work here); large batches tile at `tile_b` rows and the
    # axis stays "parallel" so multi-TC chips (v7x) can shard it.
    b8 = _round_up(B, SUBLANE)
    tb = min(_round_up(tile_b, SUBLANE), b8)
    bp = _round_up(b8, tb)
    grid = (bp // tb,)

    if bp != B:
        # NOTE: padded batch rows become nonzero after the first bias+ReLU
        # (ReLU(bias) propagates); they are sliced off below and the kernel
        # never reduces over the batch axis, so this is safe.
        x_in = jnp.zeros((bp, d_in), x.dtype).at[:B].set(x)
    else:
        x_in = x

    flat_params = []
    in_specs = [pl.BlockSpec((tb, d_in), lambda i: (i, 0))]   # batch-tiled x
    for (w_p, b_p) in packed:
        flat_params += [w_p, b_p]
        in_specs += [
            pl.BlockSpec(w_p.shape, lambda i: (0, 0)),   # weight: VMEM-resident
            pl.BlockSpec(b_p.shape, lambda i: (0, 0)),   # bias:   VMEM-resident
        ]

    kernel = functools.partial(_mlp_kernel, n_layers=n_layers)
    out = pl.pallas_call(
        kernel,
        out_shape=jax.ShapeDtypeStruct((bp, d_out), jnp.float32),
        grid_spec=pltpu.PrefetchScalarGridSpec(
            num_scalar_prefetch=0,
            grid=grid,
            in_specs=in_specs,
            out_specs=pl.BlockSpec((tb, d_out), lambda i: (i, 0)),
        ),
        compiler_params=pltpu.CompilerParams(
            dimension_semantics=("parallel",),
            vmem_limit_bytes=_vmem_limit_bytes(packed, tb, d_in, widths, d_out),
        ),
    )(x_in, *flat_params)

    return out if bp == B else out[:B]


def init_mlp_params(layer_ls, key):
    """Deterministic init mimicking nn.Linear's default U(-1/sqrt(fan_in), +)."""
    params = []
    for i in range(1, len(layer_ls)):
        fan_in, fan_out = layer_ls[i - 1], layer_ls[i]
        key, kw, kb = jax.random.split(key, 3)
        bound = 1.0 / math.sqrt(fan_in)
        # stored as (in, out) so the kernel computes x @ W
        w = jax.random.uniform(kw, (fan_in, fan_out), jnp.float32, -bound, bound)
        b = jax.random.uniform(kb, (fan_out,), jnp.float32, -bound, bound)
        params.append((w, b))
    return params


if __name__ == "__main__":
    # layer_ls defines the MLP widths: input 32, hidden 64 and 48, output 16.
    layer_ls = [32, 64, 48, 16]
    batch = 64

    key = jax.random.PRNGKey(0)
    key, kx = jax.random.split(key)
    x = jax.random.normal(kx, (batch, layer_ls[0]), dtype=jnp.float32)
    params = init_mlp_params(layer_ls, key)

    # One-time packing (padding + cast) outside the jitted forward path.
    packed = pack_params(params, compute_dtype=jnp.float32)

    # TODO(synk): the module's Adam/MSE train()/test() loops are host-side
    # training code, not part of forward(), so they are not implemented here.
    fwd = jax.jit(mlp_forward)
    out = jax.block_until_ready(fwd(packed, x))
    assert out.shape == (batch, layer_ls[-1])

    # Reference: full-f32 PyTorch-equivalent math.
    ref = x
    for i, (w, b) in enumerate(params):
        ref = jnp.dot(ref, w, precision="highest") + b
        if i < len(params) - 1:
            ref = jnp.maximum(ref, 0.0)
    err = float(jnp.max(jnp.abs(out - ref)))
    assert jnp.allclose(out, ref, atol=2e-2, rtol=2e-2), err

    print("KERNEL_OK")
</pallas_src>

<mosaic_0001>
module attributes {stable_mosaic.version = 11 : i64} {
  func.func @_mlp_kernel(%arg0: i32, %arg1: memref<64x32xf32, #tpu.memory_space<vmem>>, %arg2: memref<32x128xf32, #tpu.memory_space<vmem>>, %arg3: memref<1x128xf32, #tpu.memory_space<vmem>>, %arg4: memref<128x128xf32, #tpu.memory_space<vmem>>, %arg5: memref<1x128xf32, #tpu.memory_space<vmem>>, %arg6: memref<128x16xf32, #tpu.memory_space<vmem>>, %arg7: memref<1x16xf32, #tpu.memory_space<vmem>>, %arg8: memref<64x16xf32, #tpu.memory_space<vmem>>) attributes {dimension_semantics = [#tpu.dimension_semantics<parallel>], iteration_bounds = array<i64: 1>, scalar_prefetch = 0 : i64, scratch_operands = 0 : i64, tpu.core_type = #tpu.core_type<tc>, window_params = [{transform_indices = @transform_0, window_bounds = array<i64: 64, 32>}, {pipeline_mode = #tpu.pipeline_mode<synchronous>, transform_indices = @transform_1, window_bounds = array<i64: 32, 128>}, {pipeline_mode = #tpu.pipeline_mode<synchronous>, transform_indices = @transform_2, window_bounds = array<i64: 1, 128>}, {pipeline_mode = #tpu.pipeline_mode<synchronous>, transform_indices = @transform_3, window_bounds = array<i64: 128, 128>}, {pipeline_mode = #tpu.pipeline_mode<synchronous>, transform_indices = @transform_4, window_bounds = array<i64: 1, 128>}, {pipeline_mode = #tpu.pipeline_mode<synchronous>, transform_indices = @transform_5, window_bounds = array<i64: 128, 16>}, {pipeline_mode = #tpu.pipeline_mode<synchronous>, transform_indices = @transform_6, window_bounds = array<i64: 1, 16>}, {transform_indices = @transform_7, window_bounds = array<i64: 64, 16>}]} {
    %c0 = arith.constant 0 : index
    %c0_0 = arith.constant 0 : index
    %0 = vector.load %arg1[%c0, %c0_0] : memref<64x32xf32, #tpu.memory_space<vmem>>, vector<64x32xf32>
    %c0_1 = arith.constant 0 : index
    %c0_2 = arith.constant 0 : index
    %1 = vector.load %arg2[%c0_1, %c0_2] : memref<32x128xf32, #tpu.memory_space<vmem>>, vector<32x128xf32>
    %c0_3 = arith.constant 0 : index
    %c0_4 = arith.constant 0 : index
    %2 = vector.load %arg3[%c0_3, %c0_4] : memref<1x128xf32, #tpu.memory_space<vmem>>, vector<1x128xf32>
    %cst = arith.constant dense<0.000000e+00> : vector<64x128xf32>
    %3 = tpu.matmul %0, %1, %cst {dimension_numbers = #tpu.dot_dimension_numbers<[1], [0], [0], [1], [0, 0, 1, 1], [], []>} : vector<64x32xf32>, vector<32x128xf32>, vector<64x128xf32> -> vector<64x128xf32>
    %4 = vector.broadcast %2 : vector<1x128xf32> to vector<64x128xf32>
    %5 = arith.addf %3, %4 : vector<64x128xf32>
    %cst_5 = arith.constant 0.000000e+00 : f32
    %6 = vector.broadcast %cst_5 : f32 to vector<64x128xf32>
    %7 = arith.maximumf %5, %6 : vector<64x128xf32>
    %c0_6 = arith.constant 0 : index
    %c0_7 = arith.constant 0 : index
    %8 = vector.load %arg4[%c0_6, %c0_7] : memref<128x128xf32, #tpu.memory_space<vmem>>, vector<128x128xf32>
    %c0_8 = arith.constant 0 : index
    %c0_9 = arith.constant 0 : index
    %9 = vector.load %arg5[%c0_8, %c0_9] : memref<1x128xf32, #tpu.memory_space<vmem>>, vector<1x128xf32>
    %cst_10 = arith.constant dense<0.000000e+00> : vector<64x128xf32>
    %10 = tpu.matmul %7, %8, %cst_10 {dimension_numbers = #tpu.dot_dimension_numbers<[1], [0], [0], [1], [0, 0, 1, 1], [], []>} : vector<64x128xf32>, vector<128x128xf32>, vector<64x128xf32> -> vector<64x128xf32>
    %11 = vector.broadcast %9 : vector<1x128xf32> to vector<64x128xf32>
    %12 = arith.addf %10, %11 : vector<64x128xf32>
    %cst_11 = arith.constant 0.000000e+00 : f32
    %13 = vector.broadcast %cst_11 : f32 to vector<64x128xf32>
    %14 = arith.maximumf %12, %13 : vector<64x128xf32>
    %c0_12 = arith.constant 0 : index
    %c0_13 = arith.constant 0 : index
    %15 = vector.load %arg6[%c0_12, %c0_13] : memref<128x16xf32, #tpu.memory_space<vmem>>, vector<128x16xf32>
    %c0_14 = arith.constant 0 : index
    %c0_15 = arith.constant 0 : index
    %16 = vector.load %arg7[%c0_14, %c0_15] : memref<1x16xf32, #tpu.memory_space<vmem>>, vector<1x16xf32>
    %cst_16 = arith.constant dense<0.000000e+00> : vector<64x16xf32>
    %17 = tpu.matmul %14, %15, %cst_16 {dimension_numbers = #tpu.dot_dimension_numbers<[1], [0], [0], [1], [0, 0, 1, 1], [], []>} : vector<64x128xf32>, vector<128x16xf32>, vector<64x16xf32> -> vector<64x16xf32>
    %18 = vector.broadcast %16 : vector<1x16xf32> to vector<64x16xf32>
    %19 = arith.addf %17, %18 : vector<64x16xf32>
    %c0_17 = arith.constant 0 : index
    %c0_18 = arith.constant 0 : index
    %20 = vector.load %arg8[%c0_17, %c0_18] : memref<64x16xf32, #tpu.memory_space<vmem>>, vector<64x16xf32>
    tpu.vector_store %arg8[%c0_17, %c0_18], %19 {strides = array<i32>} : memref<64x16xf32, #tpu.memory_space<vmem>>, vector<64x16xf32>,
    return
  }
  func.func @transform_0(%arg0: i32) -> (i32, i32) {
    %c0_i32 = arith.constant 0 : i32
    %c0_i32_0 = arith.constant 0 : i32
    return %arg0, %c0_i32 : i32, i32
  }
  func.func @transform_1(%arg0: i32) -> (i32, i32) {
    %c0_i32 = arith.constant 0 : i32
    %c0_i32_0 = arith.constant 0 : i32
    %c0_i32_1 = arith.constant 0 : i32
    return %c0_i32, %c0_i32_0 : i32, i32
  }
  func.func @transform_2(%arg0: i32) -> (i32, i32) {
    %c0_i32 = arith.constant 0 : i32
    %c0_i32_0 = arith.constant 0 : i32
    %c0_i32_1 = arith.constant 0 : i32
    return %c0_i32, %c0_i32_0 : i32, i32
  }
  func.func @transform_3(%arg0: i32) -> (i32, i32) {
    %c0_i32 = arith.constant 0 : i32
    %c0_i32_0 = arith.constant 0 : i32
    %c0_i32_1 = arith.constant 0 : i32
    return %c0_i32, %c0_i32_0 : i32, i32
  }
  func.func @transform_4(%arg0: i32) -> (i32, i32) {
    %c0_i32 = arith.constant 0 : i32
    %c0_i32_0 = arith.constant 0 : i32
    %c0_i32_1 = arith.constant 0 : i32
    return %c0_i32, %c0_i32_0 : i32, i32
  }
  func.func @transform_5(%arg0: i32) -> (i32, i32) {
    %c0_i32 = arith.constant 0 : i32
    %c0_i32_0 = arith.constant 0 : i32
    %c0_i32_1 = arith.constant 0 : i32
    return %c0_i32, %c0_i32_0 : i32, i32
  }
  func.func @transform_6(%arg0: i32) -> (i32, i32) {
    %c0_i32 = arith.constant 0 : i32
    %c0_i32_0 = arith.constant 0 : i32
    %c0_i32_1 = arith.constant 0 : i32
    return %c0_i32, %c0_i32_0 : i32, i32
  }
  func.func @transform_7(%arg0: i32) -> (i32, i32) {
    %c0_i32 = arith.constant 0 : i32
    %c0_i32_0 = arith.constant 0 : i32
    return %arg0, %c0_i32 : i32, i32
  }
}

</mosaic_0001>

<bundles_post_ra>
// kernel: mlp_forward.1
= control target key start
LH: loop header
LB: loop body
LE: loop exit
PB: predicated region body
PF: predicated region fallthrough
CT: control target
= control target key end

     0   :  { %vm45_vm0 = vcmask 261120   ;;  %vm447_vm1 = vcmask 130048   ;;  %s932_s1 = inlined_call_operand.vmem [shape: f32[32,128], index: 1, kind: input, shape index: {}]   ;;  %s933_s0 = inlined_call_operand.vmem [shape: f32[64,32], index: 0, kind: input, shape index: {}]   ;;  %s934_s3 = inlined_call_operand.vmem [shape: f32[128,128], index: 3, kind: input, shape index: {}]   ;;  %s935_s5 = inlined_call_operand.vmem [shape: f32[128,16], index: 5, kind: input, shape index: {}]   ;;  %s936_s2 = inlined_call_operand.vmem [shape: f32[1,128], index: 2, kind: input, shape index: {}]   ;;  %s937_s4 = inlined_call_operand.vmem [shape: f32[1,128], index: 4, kind: input, shape index: {}]   ;;  %s938_s6 = inlined_call_operand.vmem [shape: f32[1,16], index: 6, kind: input, shape index: {}]   ;;  %s939_s7 = inlined_call_operand.vmem [shape: f32[64,16], index: 7, kind: output, shape index: {}]  }
   0x1   :  { %v34_v0 = vld [vmem:[%s932_s1] sm:$0xff]  ;;  %v35_v1 = vld [vmem:[%s932_s1 + $0x8] sm:$0xff]  ;;  %v36_v2 = vld [vmem:[%s932_s1 + $0x10] sm:$0xff] }
   0x2   :  { %v639_v3 = vpack.c.bf16 %v35_v1, %v34_v0  ;;  %v37_v4 = vld [vmem:[%s932_s1 + $0x18] sm:$0xff]  ;;  %v26_v5 = vld [vmem:[%s933_s0] sm:$0xff]  ;;  %v184_v8 = vld [vmem:[%s934_s3 + $0x8] sm:$0xff] }
   0x3   :  { %v643_v6 = vpack.c.bf16 %v37_v4, %v36_v2  ;;  %539 = vmatprep.mubr.msk.f32.mxu0 %vm45_vm0, %v26_v5  ;;  %v183_v7 = vld [vmem:[%s934_s3] sm:$0xff]  ;;  %v185_v9 = vld [vmem:[%s934_s3 + $0x10] sm:$0xff]  ;;  %v186_v11 = vld [vmem:[%s934_s3 + $0x18] sm:$0xff] }
   0x4   :  { %640 = vmatprep.subr.bf16.mxu0 %v639_v3  ;;  %v647_v10 = vpack.c.bf16 %v184_v8, %v183_v7  ;;  %v651_v12 = vpack.c.bf16 %v186_v11, %v185_v9  ;;  %v187_v13 = vld [vmem:[%s934_s3 + $0x20] sm:$0xff]  ;;  %v188_v14 = vld [vmem:[%s934_s3 + $0x28] sm:$0xff]  ;;  %v28_v16 = vld [vmem:[%s933_s0 + $0x10] sm:$0xff] }
   0x5   :  { %642 = vmatpush3.bf16.msra.mxu0 %v639_v3  ;;  %v27_v15 = vld [vmem:[%s933_s0 + $0x8] sm:$0xff]  ;;  %v655_v17 = vpack.c.bf16 %v188_v14, %v187_v13  ;;  %v189_v18 = vld [vmem:[%s934_s3 + $0x30] sm:$0xff]  ;;  %v190_v19 = vld [vmem:[%s934_s3 + $0x38] sm:$0xff] }
   0x6   :  { %644 = vmatprep.subr.bf16.mxu0 %v643_v6  ;;  %648 = vmatprep.subr.bf16.mxu1 %v647_v10  ;;  %v29_v20 = vld [vmem:[%s933_s0 + $0x18] sm:$0xff]  ;;  %v30_v21 = vld [vmem:[%s933_s0 + $0x20] sm:$0xff]  ;;  %v659_v22 = vpack.c.bf16 %v190_v19, %v189_v18  ;;  %v192_v24 = vld [vmem:[%s934_s3 + $0x48] sm:$0xff] }
   0x7   :  { %650 = vmatpush3.bf16.msra.mxu1 %v647_v10  ;;  %v191_v23 = vld [vmem:[%s934_s3 + $0x40] sm:$0xff]  ;;  %v31_v25 = vld [vmem:[%s933_s0 + $0x28] sm:$0xff]  ;;  %v32_v26 = vld [vmem:[%s933_s0 + $0x30] sm:$0xff] }
   0x8   :  { %652 = vmatprep.subr.bf16.mxu1 %v651_v12  ;;  %v663_v27 = vpack.c.bf16 %v192_v24, %v191_v23  ;;  %v193_v28 = vld [vmem:[%s934_s3 + $0x50] sm:$0xff]  ;;  %v194_v29 = vld [vmem:[%s934_s3 + $0x58] sm:$0xff]  ;;  %v195_v32 = vld [vmem:[%s934_s3 + $0x60] sm:$0xff] }
   0x9   :  { %646 = vmatpush3.bf16.msra.mxu0 %v643_v6  ;;  %v33_v30 = vld [vmem:[%s933_s0 + $0x38] sm:$0xff]  ;;  %v667_v31 = vpack.c.bf16 %v194_v29, %v193_v28  ;;  %v196_v33 = vld [vmem:[%s934_s3 + $0x68] sm:$0xff]  ;;  %v197_v35 = vld [vmem:[%s934_s3 + $0x70] sm:$0xff] }
   0xa   :  { %v671_v34 = vpack.c.bf16 %v196_v33, %v195_v32  ;;  %v198_v36 = vld [vmem:[%s934_s3 + $0x78] sm:$0xff]  ;;  %v319_v38 = vld [vmem:[%s935_s5] sm:$0xff]  ;;  %v320_v39 = vld [vmem:[%s935_s5 + $0x8] sm:$0xff] }
   0xb   :  { %654 = vmatpush3.bf16.msra.mxu1 %v651_v12  ;;  %v675_v37 = vpack.c.bf16 %v198_v36, %v197_v35  ;;  %v321_v40 = vld [vmem:[%s935_s5 + $0x10] sm:$0xff]  ;;  %v679_v41 = vpack.c.bf16 %v320_v39, %v319_v38  ;;  %v322_v42 = vld [vmem:[%s935_s5 + $0x18] sm:$0xff]  ;;  %v323_v44 = vld [vmem:[%s935_s5 + $0x20] sm:$0xff] }
   0xc   :  { %540 = vmatmul.mubr.msk.f32.vlgmr.msra.gmra.mrb[0].mxu0 %vm45_vm0, %v27_v15  ;;  %656 = vmatprep.subr.bf16.mxu1 %v655_v17  ;;  %v683_v43 = vpack.c.bf16 %v322_v42, %v321_v40  ;;  %v324_v45 = vld [vmem:[%s935_s5 + $0x28] sm:$0xff]  ;;  %v325_v47 = vld [vmem:[%s935_s5 + $0x30] sm:$0xff]  ;;  %v326_v48 = vld [vmem:[%s935_s5 + $0x38] sm:$0xff] }
   0xd   :  { %542 = vmatprep.mubr.msk.f32.mxu0 %vm45_vm0, %v28_v16  ;;  %680 = vmatprep.subr.bf16.mxu0 %v679_v41  ;;  %v687_v46 = vpack.c.bf16 %v324_v45, %v323_v44  ;;  %v691_v49 = vpack.c.bf16 %v326_v48, %v325_v47  ;;  %v327_v50 = vld [vmem:[%s935_s5 + $0x40] sm:$0xff]  ;;  %v328_v51 = vld [vmem:[%s935_s5 + $0x48] sm:$0xff]  ;;  %v329_v53 = vld [vmem:[%s935_s5 + $0x50] sm:$0xff] }
   0xe   :  { %682 = vmatpush3.bf16.msra.mxu0 %v679_v41  ;;  %v695_v52 = vpack.c.bf16 %v328_v51, %v327_v50  ;;  %v330_v54 = vld [vmem:[%s935_s5 + $0x58] sm:$0xff]  ;;  %v331_v56 = vld [vmem:[%s935_s5 + $0x60] sm:$0xff]  ;;  %v332_v57 = vld [vmem:[%s935_s5 + $0x68] sm:$0xff] }
   0xf   :  { %658 = vmatpush3.bf16.msra.mxu1 %v655_v17  ;;  %684 = vmatprep.subr.bf16.mxu0 %v683_v43  ;;  %v699_v55 = vpack.c.bf16 %v330_v54, %v329_v53  ;;  %v703_v58 = vpack.c.bf16 %v332_v57, %v331_v56  ;;  %v460_v59 = vld [vmem:[%s936_s2] ss:$0 sm:$0xff] }
  0x10   :  { %543 = vmatmul.mubr.msk.f32.gmra.mrb[2].mxu0 %vm45_vm0, %v29_v20  ;;  %660 = vmatprep.subr.bf16.mxu1 %v659_v22  ;;  %v333_v20 = vld [vmem:[%s935_s5 + $0x70] sm:$0xff]  ;;  %v469_v23 = vld [vmem:[%s937_s4] ss:$0 sm:$0xff] }
  0x11   :  { %545 = vmatprep.mubr.msk.f32.mxu0 %vm45_vm0, %v30_v21  ;;  %v334_v21 = vld [vmem:[%s935_s5 + $0x78] sm:$0xff]  ;;  %v470_v48 = vld [vmem:[%s938_s6] ss:$0 sm:$0xff] }
  0x12   :  { %686 = vmatpush3.bf16.msra.mxu0 %v683_v43 }
  0x13   :  { %662 = vmatpush3.bf16.msra.mxu1 %v659_v22  ;;  %688 = vmatprep.subr.bf16.mxu0 %v687_v46  ;;  %v707_v22 = vpack.c.bf16 %v334_v21, %v333_v20 }
  0x14   :  { %546 = vmatmul.mubr.msk.f32.gmra.mrb[4].mxu0 %vm45_vm0, %v31_v25  ;;  %664 = vmatprep.subr.bf16.mxu1 %v663_v27 }
  0x15   :  { %548 = vmatprep.mubr.msk.f32.mxu0 %vm45_vm0, %v32_v26 }
  0x16   :  { %690 = vmatpush3.bf16.msra.mxu0 %v687_v46 }
  0x17   :  { %666 = vmatpush3.bf16.msra.mxu1 %v663_v27  ;;  %692 = vmatprep.subr.bf16.mxu0 %v691_v49 }
  0x18   :  { %549 = vmatmul.mubr.msk.f32.gmra.mrb[6].mxu0 %vm45_vm0, %v33_v30  ;;  %668 = vmatprep.subr.bf16.mxu1 %v667_v31 }
  0x1a   :  { %694 = vmatpush3.bf16.msra.mxu0 %v691_v49 }
  0x1b   :  { %670 = vmatpush3.bf16.msra.mxu1 %v667_v31  ;;  %696 = vmatprep.subr.bf16.mxu0 %v695_v52 }
  0x1c   :  { %672 = vmatprep.subr.bf16.mxu1 %v671_v34 }
  0x1e   :  { %698 = vmatpush3.bf16.msra.mxu0 %v695_v52 }
  0x1f   :  { %674 = vmatpush3.bf16.msra.mxu1 %v671_v34  ;;  %700 = vmatprep.subr.bf16.mxu0 %v699_v55 }
  0x20   :  { %676 = vmatprep.subr.bf16.mxu1 %v675_v37 }
  0x22   :  { %702 = vmatpush3.bf16.msra.mxu0 %v699_v55 }
  0x23   :  { %678 = vmatpush3.bf16.msra.mxu1 %v675_v37  ;;  %704 = vmatprep.subr.bf16.mxu0 %v703_v58 }
  0x26   :  { %706 = vmatpush3.bf16.msra.mxu0 %v703_v58 }
  0x27   :  { %708 = vmatprep.subr.bf16.mxu0 %v707_v22 }
  0x2a   :  { %710 = vmatpush3.bf16.msra.mxu0 %v707_v22 }
  0xdf   :  { %v541_v60 = vpop.f32.mrb[0].mxu0 }
  0xe0   :  { %v142_v61 = vadd.f32 %v541_v60, %v460_v59  ;;  %v136_v62 = vpop.f32.mrb[1].mxu0 }
  0xe1   :  { %v137_v63 = vadd.f32 %v460_v59, %v136_v62 }
  0xe2   :  { %v176_v2 = vmax.f32 %v142_v61, 0.0 }
  0xe3   :  { %v544_v0 = vpop.f32.mrb[2].mxu0  ;;  %v175_v1 = vmax.f32 %v137_v63, 0.0 }
  0xe4   :  { %v152_v3 = vadd.f32 %v544_v0, %v460_v59  ;;  %v146_v4 = vpop.f32.mrb[3].mxu0 }
  0xe5   :  { %v147_v5 = vadd.f32 %v460_v59, %v146_v4  ;;  %583 = vmatprep.mubr.f32.mxu1 %v175_v1 }
  0xe6   :  { %584 = vmatmul.mubr.f32.vlgmr.msra.gmra.mrb[0].mxu1 %v176_v2  ;;  %v178_v8 = vmax.f32 %v152_v3, 0.0 }
  0xe7   :  { %v177_v6 = vmax.f32 %v147_v5, 0.0  ;;  %v547_v7 = vpop.f32.mrb[4].mxu0 }
  0xe8   :  { %v162_v9 = vadd.f32 %v547_v7, %v460_v59  ;;  %v156_v10 = vpop.f32.mrb[5].mxu0 }
  0xe9   :  { %v157_v11 = vadd.f32 %v460_v59, %v156_v10  ;;  %586 = vmatprep.mubr.f32.mxu1 %v177_v6 }
  0xea   :  { %587 = vmatmul.mubr.f32.gmra.mrb[2].mxu1 %v178_v8  ;;  %v180_v14 = vmax.f32 %v162_v9, 0.0 }
  0xeb   :  { %v179_v12 = vmax.f32 %v157_v11, 0.0  ;;  %v550_v13 = vpop.f32.mrb[6].mxu0 }
  0xec   :  { %v172_v15 = vadd.f32 %v550_v13, %v460_v59  ;;  %v166_v16 = vpop.f32.mrb[7].mxu0 }
  0xed   :  { %v167_v17 = vadd.f32 %v460_v59, %v166_v16  ;;  %589 = vmatprep.mubr.f32.mxu1 %v179_v12 }
  0xee   :  { %590 = vmatmul.mubr.f32.gmra.mrb[4].mxu1 %v180_v14  ;;  %v182_v19 = vmax.f32 %v172_v15, 0.0 }
  0xef   :  { %v181_v18 = vmax.f32 %v167_v17, 0.0 }
  0xf1   :  { %592 = vmatprep.mubr.f32.mxu1 %v181_v18 }
  0xf2   :  { %593 = vmatmul.mubr.f32.gmra.mrb[6].mxu1 %v182_v19 }
 0x1b9   :  { %v585_v24 = vpop.f32.mrb[0].mxu1 }
 0x1ba   :  { %v278_v25 = vadd.f32 %v585_v24, %v469_v23  ;;  %v272_v26 = vpop.f32.mrb[1].mxu1 }
 0x1bb   :  { %v273_v27 = vadd.f32 %v469_v23, %v272_v26 }
 0x1bc   :  { %v312_v30 = vmax.f32 %v278_v25, 0.0 }
 0x1bd   :  { %v311_v28 = vmax.f32 %v273_v27, 0.0  ;;  %v588_v29 = vpop.f32.mrb[2].mxu1 }
 0x1be   :  { %v288_v31 = vadd.f32 %v588_v29, %v469_v23  ;;  %v282_v32 = vpop.f32.mrb[3].mxu1 }
 0x1bf   :  { %v283_v33 = vadd.f32 %v469_v23, %v282_v32  ;;  %627 = vmatprep.mubr.f32.mxu0 %v311_v28 }
 0x1c0   :  { %628 = vmatmul.mubr.f32.vlgmr.msra.gmra.mrb[8].mxu0 %v312_v30  ;;  %v314_v36 = vmax.f32 %v288_v31, 0.0 }
 0x1c1   :  { %v313_v34 = vmax.f32 %v283_v33, 0.0  ;;  %v591_v35 = vpop.f32.mrb[4].mxu1 }
 0x1c2   :  { %v298_v37 = vadd.f32 %v591_v35, %v469_v23  ;;  %v292_v38 = vpop.f32.mrb[5].mxu1 }
 0x1c3   :  { %v293_v39 = vadd.f32 %v469_v23, %v292_v38  ;;  %630 = vmatprep.mubr.f32.mxu0 %v313_v34 }
 0x1c4   :  { %631 = vmatmul.mubr.f32.gmra.mrb[10].mxu0 %v314_v36  ;;  %v316_v42 = vmax.f32 %v298_v37, 0.0 }
 0x1c5   :  { %v315_v40 = vmax.f32 %v293_v39, 0.0  ;;  %v594_v41 = vpop.f32.mrb[6].mxu1 }
 0x1c6   :  { %v308_v43 = vadd.f32 %v594_v41, %v469_v23  ;;  %v302_v44 = vpop.f32.mrb[7].mxu1 }
 0x1c7   :  { %v303_v45 = vadd.f32 %v469_v23, %v302_v44  ;;  %633 = vmatprep.mubr.f32.mxu0 %v315_v40 }
 0x1c8   :  { %634 = vmatmul.mubr.f32.gmra.mrb[12].mxu0 %v316_v42  ;;  %v318_v47 = vmax.f32 %v308_v43, 0.0 }
 0x1c9   :  { %v317_v46 = vmax.f32 %v303_v45, 0.0 }
 0x1cb   :  { %636 = vmatprep.mubr.f32.mxu0 %v317_v46 }
 0x1cc   :  { %637 = vmatmul.mubr.f32.gmra.mrb[14].mxu0 %v318_v47 }
 0x293   :  { %v629_v49 = vpop.f32.mrb[8].mxu0 }
 0x294   :  { %v414_v50 = vadd.f32 %v629_v49, %v470_v48  ;;  %v408_v51 = vpop.f32.mrb[9].mxu0 }
 0x295   :  { %v409_v52 = vadd.f32 %v470_v48, %v408_v51 }
 0x296   :  { %449 = vst.msk [vmem:[%s939_s7 + $0x8] sm:$0xff] %vm447_vm1, %v414_v50 }
 0x297   :  { %448 = vst.msk [vmem:[%s939_s7] sm:$0xff] %vm447_vm1, %v409_v52  ;;  %v632_v53 = vpop.f32.mrb[10].mxu0 }
 0x298   :  { %v424_v54 = vadd.f32 %v632_v53, %v470_v48  ;;  %v418_v55 = vpop.f32.mrb[11].mxu0 }
 0x299   :  { %v419_v56 = vadd.f32 %v470_v48, %v418_v55 }
 0x29a   :  { %451 = vst.msk [vmem:[%s939_s7 + $0x18] sm:$0xff] %vm447_vm1, %v424_v54 }
 0x29b   :  { %450 = vst.msk [vmem:[%s939_s7 + $0x10] sm:$0xff] %vm447_vm1, %v419_v56  ;;  %v635_v57 = vpop.f32.mrb[12].mxu0 }
 0x29c   :  { %v434_v58 = vadd.f32 %v635_v57, %v470_v48  ;;  %v428_v59 = vpop.f32.mrb[13].mxu0 }
 0x29d   :  { %v429_v60 = vadd.f32 %v470_v48, %v428_v59 }
 0x29e   :  { %453 = vst.msk [vmem:[%s939_s7 + $0x28] sm:$0xff] %vm447_vm1, %v434_v58 }
 0x29f   :  { %452 = vst.msk [vmem:[%s939_s7 + $0x20] sm:$0xff] %vm447_vm1, %v429_v60  ;;  %v638_v61 = vpop.f32.mrb[14].mxu0 }
 0x2a0   :  { %v444_v62 = vadd.f32 %v638_v61, %v470_v48  ;;  %v438_v63 = vpop.f32.mrb[15].mxu0 }
 0x2a1   :  { %v439_v0 = vadd.f32 %v470_v48, %v438_v63 }
 0x2a2   :  { %455 = vst.msk [vmem:[%s939_s7 + $0x38] sm:$0xff] %vm447_vm1, %v444_v62 }
 0x2a3   :  { %454 = vst.msk [vmem:[%s939_s7 + $0x30] sm:$0xff] %vm447_vm1, %v439_v0 }

</bundles_post_ra>
